<compile_context>
chip_gen: v7x
topology: tpu7x:2x2x1
jax: 0.10.0
libtpu: 0.0.40
codegen_flags: <defaults>
</compile_context>

<pallas_src>
import jax
import jax.numpy as jnp
from jax.experimental import pallas as pl
from jax.experimental.pallas import tpu as pltpu


def _pwtd_kernel(x_ref, wb_ref, b_ref, o_ref):
    # x_ref : (Cin, TT)      tile of the NCT input (batch dim squeezed)
    # wb_ref: (Cin, out)     banded weights (channel padding + stride folded in)
    # b_ref : (1,  out) f32  bias
    # o_ref : (TT, out)
    acc = jax.lax.dot_general(                       # single MXU matmul,
        x_ref[...], wb_ref[...],                     # contracting on Cin
        dimension_numbers=(((0,), (0,)), ((), ())),  # (lhs transposed feed)
        preferred_element_type=jnp.float32)          # -> (TT, out) f32
    o_ref[...] = (acc + b_ref[...]).astype(o_ref.dtype)


def make_pwtd_band(weights, bias, *, in_channels, kernel_size, strides, padding,
                   compute_dtype):
    """Fold channel zero-padding + stride into a dense banded weight matrix.

    W_band[c, j] = W[j, c - j*strides + padding] inside the band, 0 elsewhere.
    Precompute this once when the weights are static (it is an O(Cin*out)
    gather/select chain you do not want in front of every launch)."""
    L = in_channels + 2 * padding - (kernel_size - 1)
    assert (L - 1) % strides == 0, (in_channels, kernel_size, strides, padding)
    out_size = (L - 1) // strides + 1
    assert weights.shape == (out_size, 1, kernel_size), weights.shape

    w2 = weights.reshape(out_size, kernel_size)                 # (out, K)
    c = jnp.arange(in_channels)[:, None]                        # (Cin, 1)
    j = jnp.arange(out_size)[None, :]                           # (1, out)
    k = c - j * strides + padding                               # (Cin, out)
    valid = (k >= 0) & (k < kernel_size)
    wb = jnp.where(valid, w2[j, jnp.clip(k, 0, kernel_size - 1)], 0)
    wb = wb.astype(compute_dtype)                               # (Cin, out)

    if bias is None:
        b2 = jnp.zeros((1, out_size), jnp.float32)
    else:
        b2 = bias.reshape(1, out_size).astype(jnp.float32)      # keep f32
    return wb, b2, out_size


def pwtd_conv1d(x, weights, bias, *, kernel_size, strides=1, padding=0,
                tile_t=1024):
    """x: (B, Cin, T); weights: (out_size, 1, K); bias: (out_size, 1) or None.
    Returns (B, T, out_size) — the module's channels-last output."""
    B, Cin, T = x.shape
    wb, b2, out_size = make_pwtd_band(
        weights, bias, in_channels=Cin, kernel_size=kernel_size,
        strides=strides, padding=padding, compute_dtype=x.dtype)

    itemsize = jnp.dtype(x.dtype).itemsize

    # ---- time tile selection (mem-bound roofline: as large as practical) ----
    if T <= 128:
        tt = T
    else:
        tt = min(tile_t, T)
        if tt < T:
            tt = max(128, (tt // 128) * 128)
        # v7x has 2 TensorCores sharded over "parallel" grid axes: make sure
        # the grid has >= 2 steps when B == 1.
        if B == 1 and tt >= T:
            tt = max(128, ((T // 2) // 128) * 128)
        # VMEM budget: double-buffered x + out blocks comfortably under the
        # scoped limit on every generation (v7x: 32 MiB scoped / 64 MiB phys).
        budget = 16 * 1024 * 1024

        def _step_bytes(t):
            return 2 * (Cin * t + t * out_size) * itemsize

        while tt > 128 and _step_bytes(tt) > budget:
            tt = max(128, ((tt // 2) // 128) * 128)

    grid = (B, pl.cdiv(T, tt))  # tails masked by Pallas; no divisibility assert.
    # (Garbage time columns in a tail x tile flow through the matmul, but the
    #  corresponding out-of-bounds output rows are never written back, and
    #  nothing is accumulated across grid steps — keep that invariant.)

    est_vmem = (2 * (Cin * tt + tt * out_size) * itemsize   # x + out (2 bufs)
                + 2 * Cin * out_size * itemsize             # wb (2 bufs)
                + 2 * out_size * 4)                         # bias f32 (2 bufs)
    vmem_limit = int(min(64 * 1024 * 1024, max(8 * 1024 * 1024, 2 * est_vmem)))

    y = pl.pallas_call(
        _pwtd_kernel,
        out_shape=jax.ShapeDtypeStruct((B, T, out_size), x.dtype),
        grid_spec=pltpu.PrefetchScalarGridSpec(
            num_scalar_prefetch=0,
            grid=grid,
            in_specs=[
                pl.BlockSpec((pl.Squeezed(), Cin, tt), lambda b, t: (b, 0, t)),
                pl.BlockSpec((Cin, out_size), lambda b, t: (0, 0)),
                pl.BlockSpec((1, out_size), lambda b, t: (0, 0)),
            ],
            out_specs=pl.BlockSpec((pl.Squeezed(), tt, out_size),
                                   lambda b, t: (b, t, 0)),
        ),
        compiler_params=pltpu.CompilerParams(
            dimension_semantics=("parallel", "parallel"),
            vmem_limit_bytes=vmem_limit),
    )(x, wb, b2)

    return y


def _ref_forward(x, weights, bias, kernel_size, strides, padding):
    # Plain-JAX reference of the intended forward pass (conv over padded channels).
    out_size = weights.shape[0]
    xp = jnp.pad(jnp.transpose(x, (0, 2, 1)), ((0, 0), (0, 0), (padding, padding)))
    idx = jnp.arange(out_size)[:, None] * strides + jnp.arange(kernel_size)[None, :]
    gath = xp[..., idx]                                          # (B, T, out, K)
    out = jnp.einsum("btok,ok->bto", gath, weights.reshape(out_size, kernel_size))
    if bias is not None:
        out = out + bias.reshape(out_size)
    return out


if __name__ == "__main__":
    key = jax.random.PRNGKey(0)
    k1, k2, k3, k4 = jax.random.split(key, 4)

    # Case 1: B=2, Cin=32, T=16, K=3, padding='same' (->1), strides=1 => out_size=32
    B, Cin, T, K, pad, s = 2, 32, 16, 3, 1, 1
    out_size = (Cin + 2 * pad - (K - 1) - 1) // s + 1
    w = jax.random.normal(k1, (out_size, 1, K), jnp.float32) / jnp.sqrt(jnp.float32(K))
    b = jnp.zeros((out_size, 1), jnp.float32)
    x = jax.random.normal(k2, (B, Cin, T), jnp.float32)

    y = jax.block_until_ready(pwtd_conv1d(x, w, b, kernel_size=K, strides=s, padding=pad))
    ref = _ref_forward(x, w, b, K, s, pad)
    assert y.shape == (B, T, out_size), y.shape
    assert jnp.allclose(y, ref, atol=1e-5, rtol=1e-5), float(jnp.max(jnp.abs(y - ref)))

    # Case 2 (strides>1, no bias): B=2, Cin=48, T=16, K=4, pad=0, strides=2 => out_size=23
    B2, Cin2, T2, K2, pad2, s2 = 2, 48, 16, 4, 0, 2
    out2 = (Cin2 + 2 * pad2 - (K2 - 1) - 1) // s2 + 1
    w2 = jax.random.normal(k3, (out2, 1, K2), jnp.float32) / jnp.sqrt(jnp.float32(K2))
    x2 = jax.random.normal(k4, (B2, Cin2, T2), jnp.float32)

    y2 = jax.block_until_ready(
        pwtd_conv1d(x2, w2, None, kernel_size=K2, strides=s2, padding=pad2))
    ref2 = _ref_forward(x2, w2, None, K2, s2, pad2)
    assert y2.shape == (B2, T2, out2), y2.shape
    assert jnp.allclose(y2, ref2, atol=1e-5, rtol=1e-5), float(jnp.max(jnp.abs(y2 - ref2)))

    print("KERNEL_OK")
</pallas_src>

<mosaic_0001>
module attributes {stable_mosaic.version = 11 : i64} {
  func.func @_pwtd_kernel(%arg0: i32, %arg1: i32, %arg2: memref<1x32x16xf32, #tpu.memory_space<vmem>>, %arg3: memref<32x32xf32, #tpu.memory_space<vmem>>, %arg4: memref<1x32xf32, #tpu.memory_space<vmem>>, %arg5: memref<1x16x32xf32, #tpu.memory_space<vmem>>) attributes {dimension_semantics = [#tpu.dimension_semantics<parallel>, #tpu.dimension_semantics<parallel>], iteration_bounds = array<i64: 2, 1>, scalar_prefetch = 0 : i64, scratch_operands = 0 : i64, tpu.core_type = #tpu.core_type<tc>, window_params = [{transform_indices = @transform_0, window_bounds = array<i64: 1, 32, 16>}, {pipeline_mode = #tpu.pipeline_mode<synchronous>, transform_indices = @transform_1, window_bounds = array<i64: 32, 32>}, {pipeline_mode = #tpu.pipeline_mode<synchronous>, transform_indices = @transform_2, window_bounds = array<i64: 1, 32>}, {transform_indices = @transform_3, window_bounds = array<i64: 1, 16, 32>}]} {
    %c0 = arith.constant 0 : index
    %c0_0 = arith.constant 0 : index
    %c0_1 = arith.constant 0 : index
    %0 = vector.load %arg2[%c0, %c0_0, %c0_1] : memref<1x32x16xf32, #tpu.memory_space<vmem>>, vector<1x32x16xf32>
    %1 = vector.shape_cast %0 : vector<1x32x16xf32> to vector<32x16xf32>
    %c0_2 = arith.constant 0 : index
    %c0_3 = arith.constant 0 : index
    %2 = vector.load %arg3[%c0_2, %c0_3] : memref<32x32xf32, #tpu.memory_space<vmem>>, vector<32x32xf32>
    %cst = arith.constant dense<0.000000e+00> : vector<16x32xf32>
    %3 = tpu.matmul %1, %2, %cst {dimension_numbers = #tpu.dot_dimension_numbers<[0], [0], [1], [1], [0, 1, 1, 1], [], []>} : vector<32x16xf32>, vector<32x32xf32>, vector<16x32xf32> -> vector<16x32xf32>
    %c0_4 = arith.constant 0 : index
    %c0_5 = arith.constant 0 : index
    %4 = vector.load %arg4[%c0_4, %c0_5] : memref<1x32xf32, #tpu.memory_space<vmem>>, vector<1x32xf32>
    %5 = vector.broadcast %4 : vector<1x32xf32> to vector<16x32xf32>
    %6 = arith.addf %3, %5 : vector<16x32xf32>
    %c0_6 = arith.constant 0 : index
    %c0_7 = arith.constant 0 : index
    %c0_8 = arith.constant 0 : index
    %7 = vector.load %arg5[%c0_6, %c0_7, %c0_8] : memref<1x16x32xf32, #tpu.memory_space<vmem>>, vector<1x16x32xf32>
    %8 = vector.shape_cast %7 : vector<1x16x32xf32> to vector<16x32xf32>
    %9 = vector.shape_cast %6 : vector<16x32xf32> to vector<1x16x32xf32>
    tpu.vector_store %arg5[%c0_6, %c0_7, %c0_8], %9 {strides = array<i32>} : memref<1x16x32xf32, #tpu.memory_space<vmem>>, vector<1x16x32xf32>,
    return
  }
  func.func @transform_0(%arg0: i32, %arg1: i32) -> (i32, i32, i32) {
    %c0_i32 = arith.constant 0 : i32
    %c0_i32_0 = arith.constant 0 : i32
    return %arg0, %c0_i32, %arg1 : i32, i32, i32
  }
  func.func @transform_1(%arg0: i32, %arg1: i32) -> (i32, i32) {
    %c0_i32 = arith.constant 0 : i32
    %c0_i32_0 = arith.constant 0 : i32
    %c0_i32_1 = arith.constant 0 : i32
    return %c0_i32, %c0_i32_0 : i32, i32
  }
  func.func @transform_2(%arg0: i32, %arg1: i32) -> (i32, i32) {
    %c0_i32 = arith.constant 0 : i32
    %c0_i32_0 = arith.constant 0 : i32
    %c0_i32_1 = arith.constant 0 : i32
    return %c0_i32, %c0_i32_0 : i32, i32
  }
  func.func @transform_3(%arg0: i32, %arg1: i32) -> (i32, i32, i32) {
    %c0_i32 = arith.constant 0 : i32
    %c0_i32_0 = arith.constant 0 : i32
    return %arg0, %arg1, %c0_i32 : i32, i32, i32
  }
}

</mosaic_0001>

<bundles_post_ra>
// kernel: tpu_custom_call.1
= control target key start
LH: loop header
LB: loop body
LE: loop exit
PB: predicated region body
PF: predicated region fallthrough
CT: control target
= control target key end

     0   :  { %8 = vsyncpa [#allocation3], 0  ;;  %s759_s0 = inlined_call_operand.vmem [shape: f32[2,32,16], index: 0, kind: input, shape index: {}]   ;;  %s760_s1 = inlined_call_operand.vmem [shape: f32[32,32], index: 1, kind: input, shape index: {}]   ;;  %s761_s2 = inlined_call_operand.vmem [shape: f32[1,32], index: 2, kind: input, shape index: {}]   ;;  %s762_s3 = inlined_call_operand.hbm [shape: f32[2,16,32], index: 3, kind: output, shape index: {}]  }
   0x1   :  { %10 = vsyncpa [#allocation3 + $0x1], 0  ;;  %s625_s12 = smov 0   ;;  %s627_s13 = smov 0  }
   0x2   :  { %s629_s14 = smov 0   ;;  %s631_s15 = smov 0  }
   0x3   :  { %s633_s16 = smov 0   ;;  %s635_s17 = smov 0  }
   0x4 LB: > { %s421_s18 = sadd.s32 4294967295, %s600_s17   ;;  %s422_s19 = sadd.s32 4294967294, %s600_s17   ;;  %s600_s17 = sphi %s635_s17, %s16_s17   ;;  %s596_s16 = sphi %s633_s16, %s769_s16   ;;  %s592_s15 = sphi %s631_s15, %s768_s15   ;;  %s588_s14 = sphi %s629_s14, %s767_s14   ;;  %s584_s13 = sphi %s627_s13, %s766_s13   ;;  %s580_s12 = sphi %s625_s12, %s765_s12  }
   0x5   : > { %s28_s20 = sadd.s32 1, %s596_s16  ;;  %s107_s21 = sadd.s32 1, %s588_s14 }
   0x6   : > { %p30_p0 = scmp.ge.s32.totalorder %s28_s20, 2  ;;  %p117_p1 = scmp.ne.s32.totalorder %s588_s14, %s584_s13 }
   0x7   : > { %p118_p2 = scmp.eq.s32.totalorder %s421_s18, 1  ;;  %p123_p3 = scmp.ne.s32.totalorder %s584_s13, %s580_s12 }
   0x8   : > { %s771_s20 = smov (%p30_p0, %s28_s20), 0  ;;  %p124_p5 = scmp.eq.s32.totalorder %s422_s19, 1 }
   0x9   : > { %p665_p4 = por %p118_p2, %p117_p1  ;;  %s102_s23 = ssub.s32 %s596_s16, %s771_s20 }
   0xa   : > { %p425_p6 = scmp.ge.s32.totalorder %s600_s17, 1  ;;  %p105_p7 = scmp.eq.s32.totalorder %s102_s23, 0 }
   0xb   : > { %p672_p8 = por %p124_p5, %p123_p3  ;;  %p159_p9 = scmp.lt.s32.totalorder %s600_s17, 3 }
   0xc   : > { %s678_s25 = scalar_select %p105_p7, %s588_s14, %s107_s21  }
   0xd   : > { %p160_p10 = pnand %p425_p6, %p159_p9 }
   0xe   : > { %p186_p11 = scmp.lt.s32.totalorder (!%p160_p10), %s592_s15, 1  ;;  %v199_v0 = vld [vmem:[%s760_s1] sm:$0xff] (!%p160_p10)  ;;  %v200_v1 = vld [vmem:[%s760_s1 + $0x8] sm:$0xff] (!%p160_p10)  ;;  %v201_v3 = vld [vmem:[%s760_s1 + $0x10] sm:$0xff] (!%p160_p10)  ;;  %vm242_vm0 = vcmask (!%p160_p10), 261120   ;;  %s183_s18 = sand.u32 (!%p160_p10), 1, %s584_s13  }
   0xf   : > { %163 = sbr.rel (%p160_p10) target bundleno = 390 (0x186), region = 32  ;;  %v456_v2 = vpack.c.bf16 (!%p160_p10), %v200_v1, %v199_v0  ;;  %v202_v4 = vld [vmem:[%s760_s1 + $0x18] sm:$0xff] (!%p160_p10)  ;;  %s426_s19 = sshll.u32 (!%p160_p10), %s183_s18, 4  ;;  %v429_v12 = vld [vmem:[%s761_s2] ss:$0 sm:$0xff] (!%p160_p10) }
  0x10   : > { %v460_v6 = vpack.c.bf16 (!%p160_p10), %v202_v4, %v201_v3  ;;  %s185_s26 = scalar_lea.vmem (!%p160_p10), [#allocation2], %s426_s19  ;;  %s438_s28 = sshll.u32 (!%p160_p10), %s592_s15, 8 }
  0x11   : > { %457 = vmatprep.subr.bf16.mxu0 (!%p160_p10), %v456_v2  ;;  %s342_s27 = sshll.u32 (!%p160_p10), %s185_s26, 4  ;;  %s713_s5 = scalar_lea.sflag (!%p160_p10), [#allocation3], %s183_s18  ;;  %s704_s27 = int_to_ptr.vmem [resolvable:$true] %s342_s27 }
  0x12   : > { %459 = vmatpush3.bf16.msra.mxu0 (!%p160_p10), %v456_v2  ;;  %s602_s6 = smov (!%p160_p10), [#allocation2]  }
  0x13   : > { %461 = vmatprep.subr.bf16.mxu0 (!%p160_p10), %v460_v6 }
  0x16   : > { %s187_s30 = scalar_select %p186_p11, %s592_s15, 1  ;;  %463 = vmatpush3.bf16.msra.mxu0 %v460_v6 }
  0x17   : > { %s522_s15 = scalar_lea.vmem %s704_s27, 256 }
  0x18   : > { %s437_s4 = sshll.u32 %s187_s30, 5  ;;  %p523_p12 = scmp.ne.s32.totalorder %s704_s27, %s522_s15 }
  0x19   : > { %s193_s7 = scalar_lea.vmem %s759_s0, %s437_s4  ;;  %s709_s4 = scalar_lea.hbm %s762_s3, %s438_s28 }
  0x1a   : > { %v195_v5 = vld [vmem:[%s193_s7] sm:$0xff]  ;;  %v196_v7 = vld [vmem:[%s193_s7 + $0x8] sm:$0xff]  ;;  %v197_v8 = vld [vmem:[%s193_s7 + $0x10] sm:$0xff]  ;;  %p524_p13 = pnand %p523_p12, %p665_p4 }
  0x1b   : > { %210 = vxpose.xlu0.b32.start [1/4] (short) (narrow) %v195_v5, 16  ;;  %v198_v9 = vld [vmem:[%s193_s7 + $0x18] sm:$0xff]  ;;  %s526_s7 = sshll.u32 %s602_s6, 4  ;;  %s527_s7 = int_to_ptr.vmem [resolvable:$false] %s526_s7 }
  0x1c   : > { %p525_p0 = pneg %p524_p13  ;;  %s528_s8 = scalar_lea.vmem %s527_s7, 512 }
  0x1d   : > { %p529_p1 = scmp.lt.s32.totalorder %s704_s27, %s527_s7  ;;  %p530_p2 = scmp.lt.s32.totalorder %s528_s8, %s522_s15 }
  0x1f   : > { %211 = vxpose.xlu0.b32.cont [2/4] (short) (narrow) %v196_v7, 16  ;;  %p531_p3 = por %p530_p2, %p529_p1 }
  0x21   : > { %p532_p5 = pnand %p531_p3, %p525_p0 }
  0x23   : > { %212 = vxpose.xlu0.b32.cont [3/4] (short) (narrow) %v197_v8, 16 }
  0x27   : > { %213 = vxpose.xlu0.b32.end [4/4] (short) (narrow) %v198_v9, 16 }
  0x9b   : > { %v226_v10 = vpop.trf.xlu0 }
  0x9c   : > { %453 = vmatprep.mubr.msk.f32.mxu0 %vm242_vm0, %v226_v10 }
  0x9f   : > { %v227_v11 = vpop.trf.xlu0 }
  0xa0   : > { %454 = vmatmul.mubr.msk.f32.vlgmr.msra.gmra.mrb[0].mxu0 %vm242_vm0, %v227_v11 }
 0x173   : > { %v455_v13 = vpop.f32.mrb[0].mxu0 }
 0x174   : > { %v321_v14 = vadd.f32 %v455_v13, %v429_v12  ;;  %v315_v15 = vpop.f32.mrb[1].mxu0 }
 0x175   : > { %v316_v16 = vadd.f32 %v429_v12, %v315_v15 }
 0x176   : > { %325 = vst.msk [vmem:[%s185_s26 + $0x8] sm:$0xff] %vm242_vm0, %v321_v14 }
 0x177   : > { %324 = vst.msk [vmem:[%s185_s26] sm:$0xff] %vm242_vm0, %v316_v16 }
 0x178   : > { %535 = shalt.err (!%p532_p5)
}
 0x179   : > { %s536_s9 = scalar_lea.hbm %s709_s4, 256  ;;  %s540_s18 = scalar_lea.hbm %s762_s3, 512 }
 0x17a   : > { %p537_p6 = scmp.ne.s32.totalorder %s709_s4, %s536_s9  ;;  %p541_p10 = scmp.lt.u32.totalorder %s709_s4, %s762_s3 }
 0x17b   : > { %p542_p11 = scmp.lt.u32.totalorder %s540_s18, %s536_s9  ;;  %p544_p13 = scmp.lt.u32.totalorder %s536_s9, %s709_s4 }
 0x17c   : > { %p538_p7 = pnand %p537_p6, %p665_p4 }
 0x17d   : > { %p543_p12 = por %p542_p11, %p541_p10 }
 0x17e   : > { %p539_p9 = pneg %p538_p7 }
 0x17f   : > { %p545_p0 = por %p544_p13, %p543_p12 }
 0x181   : > { %p546_p1 = pnand %p545_p0, %p539_p9 }
 0x183   : > { %549 = shalt.err (!%p546_p1)
}
 0x184   : > { %s603_s23 = smov 128   ;;  %s604_s26 = smov 8  }
 0x185   : > { %464 = dma.vmem_to_hbm [thread:$0]  (%p665_p4), %s704_s27, 256, %s709_s4, %s713_s5, %s603_s23, %s603_s23, %s604_s26  }
 0x186 PF: > { %p470_p2 = scmp.ge.s32.totalorder %s600_s17, 2  ;;  %s357_s28 = sand.u32 1, %s580_s12  }
 0x187   : > { %s358_s29 = scalar_lea.sflag [#allocation3], %s357_s28 }
 0x188   : > { %p467_p3 = pnand %p470_p2, %p672_p8 }
 0x18a   : > { %575 = dma.done.wait (!%p467_p3), %s358_s29, 256  }
 0x18b   : > { %577 = vsyncadd (!%p467_p3), %s358_s29, 4294967040  ;;  %s16_s17 = sadd.s32 1, %s600_s17   ;;  %s765_s12 = smov %s584_s13 }
 0x18c   : > { %p13_p5 = scmp.ge.s32.totalorder %s16_s17, 4   ;;  %s766_s13 = smov %s588_s14 }
 0x18d   : > { %s767_s14 = smov %s678_s25  ;;  %s768_s15 = smov %s596_s16 }
 0x18e   : > { %s769_s16 = smov %s771_s20  ;;  %15 = sbr.rel (!%p13_p5) target bundleno = 4 (0x4), region = 67 }
 0x195   :  { %363 = vsyncpa [#allocation3], 1 }
 0x196   :  { %365 = vsyncpa [#allocation3 + $0x1], 1 }

</bundles_post_ra>
